<compile_context>
chip_gen: v5e
topology: v5e:2x2
jax: 0.10.0
libtpu: 0.0.40
codegen_flags: <defaults>
</compile_context>

<pallas_src>
import jax
import jax.numpy as jnp
from jax import lax
from jax.experimental import pallas as pl
from jax.experimental.pallas import tpu as pltpu

# ----------------------------- config ------------------------------------- #
BATCH = 8
IN_FEATURES = 32
OUT_FEATURES = 64          # true feature width (divisible by num_heads=4)
F_PAD = 128                # lane-padded feature width (one full vreg lane row)
NUM_NODES = 3              # input_down holds NUM_NODES-1 tensors before append
NUM_HEADS = 4
LN_EPS = 1e-5


# --------------------------- shared math ----------------------------------- #
def _gelu_tanh(x):
    # tanh-approximate GELU (EUP slot; |diff| vs exact erf GELU <~ 3e-4).
    c = jnp.float32(0.7978845608028654)  # sqrt(2/pi)
    return 0.5 * x * (1.0 + jnp.tanh(c * (x + 0.044715 * x * x * x)))


def _gelu_exact(x):
    # PyTorch nn.GELU() default (exact erf) — used only by the f32 reference.
    return 0.5 * x * (1.0 + lax.erf(x * (1.0 / jnp.sqrt(2.0).astype(x.dtype))))


def _layernorm_masked(x, gamma, beta, mask, inv_n):
    # x's padded lanes are exactly zero (zero-padded weight cols / biases), so the
    # mean over the real features is sum(x) / OUT_FEATURES.  The variance reduction
    # masks the padded lanes (which hold -mean after centering).  gamma/beta are
    # zero-padded, so padded lanes come out exactly 0.
    mean = jnp.sum(x, axis=-1, keepdims=True) * inv_n
    xc = (x - mean) * mask
    var = jnp.sum(xc * xc, axis=-1, keepdims=True) * inv_n
    return xc * lax.rsqrt(var + LN_EPS) * gamma + beta


def _layernorm(x, gamma, beta):
    mean = jnp.mean(x, axis=-1, keepdims=True)
    xc = x - mean
    var = jnp.mean(xc * xc, axis=-1, keepdims=True)
    return xc * lax.rsqrt(var + LN_EPS) * gamma + beta


def _forward_math(up_bf, dcat_bf, w1p, w2p, wvop, rows):
    """Exact padded math the kernel executes (bf16 MXU operands, f32 accumulation).

    Shared by the Pallas kernel body and the matched-precision pure-JAX reference.
    rows layout (8, F_PAD): b1, g1, be1, b2, g2, be2, bvo, lane-mask.
    """
    f, fp = OUT_FEATURES, F_PAD
    b1, g1, be1 = rows[0:1], rows[1:2], rows[2:3]
    b2, g2, be2 = rows[3:4], rows[4:5], rows[5:6]
    bvo, mask = rows[6:7], rows[7:8]
    inv_n = jnp.float32(1.0 / f)

    # mid_linear -> mid_norm -> GELU   (mid_dropout = identity in eval mode)
    h = jnp.dot(up_bf, w1p, preferred_element_type=jnp.float32) + b1
    h = _gelu_tanh(_layernorm_masked(h, g1, be1, mask, inv_n))

    # concat([d0, d1, h], 1) @ W2^T  ==  dcat @ W2p[:2f] + h_pad @ W2p[2f:2f+fp]
    # (d0|d1 pre-concatenated on host into a lane-dense (B, 128) operand; static,
    #  sublane-aligned W2p row slices — no in-kernel concat)
    xm = jnp.dot(dcat_bf, w2p[0:2 * f, :], preferred_element_type=jnp.float32)
    xm = xm + jnp.dot(h.astype(jnp.bfloat16), w2p[2 * f:2 * f + fp, :],
                      preferred_element_type=jnp.float32)
    xm = xm + b2
    xm = _gelu_tanh(_layernorm_masked(xm, g2, be2, mask, inv_n))

    # MultiheadAttention with seq_len == 1: softmax over a single key == 1, so the
    # q/k projections cancel exactly and the whole block is one fused matmul:
    #   attn = out_proj(v_proj(xm)) = xm @ (Wv^T Wo^T) + (bv Wo^T + bo) = xm @ Wvo + bvo
    attn = jnp.dot(xm.astype(jnp.bfloat16), wvop,
                   preferred_element_type=jnp.float32) + bvo

    return attn + h


# ------------------------------ Pallas kernel ------------------------------ #
def mid_triangle1_kernel(up_ref, dcat_ref, w1_ref, w2_ref, wvo_ref, rows_ref,
                         out_ref):
    out = _forward_math(up_ref[...], dcat_ref[...], w1_ref[...], w2_ref[...],
                        wvo_ref[...], rows_ref[...])
    out_ref[...] = out.astype(out_ref.dtype)   # lane-dense (tb, 128) unmasked store


# ------------------------- host-side weight folding ------------------------ #
def fold_params(params):
    """Once-per-model prep: bf16 weights, 64->128 lane padding, Wv@Wo fold, (8,128) slab."""
    bf = jnp.bfloat16
    f, fp = OUT_FEATURES, F_PAD
    pad_cols = lambda a: jnp.pad(a, ((0, 0), (0, fp - f)))
    pad_vec = lambda v: jnp.pad(v, (0, fp - f))

    w1p = pad_cols(params["w1_t"]).astype(bf)                       # (F_in, 128)

    w2_t = params["w2_t"]                                           # (3F, F) = (192, 64)
    w2d = pad_cols(w2_t[0:2 * f, :])                                # (128, 128) d0|d1 rows
    w2h = jnp.zeros((fp, fp), jnp.float32).at[0:f, :].set(
        pad_cols(w2_t[2 * f:3 * f, :]))                             # (128, 128) h rows (padded rows 0)
    w2p = jnp.concatenate([w2d, w2h], axis=0).astype(bf)            # (256, 128)

    wvo = params["wv_t"] @ params["wo_t"]                           # (64, 64) fused V+out proj
    wvop = jnp.zeros((fp, fp), jnp.float32).at[0:f, 0:f].set(wvo).astype(bf)
    bvo = params["bv"] @ params["wo_t"] + params["bo"]              # (64,)

    mask = jnp.concatenate([jnp.ones((f,), jnp.float32),
                            jnp.zeros((fp - f,), jnp.float32)])     # real-lane mask

    rows = jnp.stack(                                               # (8, 128) single DMA
        [pad_vec(params["b1"]), pad_vec(params["g1"]), pad_vec(params["be1"]),
         pad_vec(params["b2"]), pad_vec(params["g2"]), pad_vec(params["be2"]),
         pad_vec(bvo), mask], axis=0)

    return {"w1p": w1p, "w2p": w2p, "wvop": wvop, "rows": rows}


# ------------------------------ call wrapper -------------------------------- #
def _pick_row_block(b):
    """Batch row-block. Big tiles (per-grid-step overhead ~0.35 us), but >= 2 grid
    steps for large batches so v7x's two TensorCores both get work."""
    cap = 1024  # v5e: cap ~4096 or set vmem_limit_bytes; v6e/v7x can go to 2048
    if b <= 16:
        return b                                  # tiny batch: launch-bound anyway
    half = ((pl.cdiv(b, 2) + 7) // 8) * 8          # >= 2 grid steps, multiple of 8
    return min(cap, half)


def _mid_triangle1_apply(input_up, d0, d1, folded):
    """input_up: (B, IN_FEATURES); d0, d1: (B, OUT_FEATURES). Returns (B, OUT_FEATURES) f32."""
    up_bf = input_up.astype(jnp.bfloat16)
    dcat_bf = jnp.concatenate([d0, d1], axis=1).astype(jnp.bfloat16)   # (B, 128) lane-dense
    b, f_in = up_bf.shape
    fp = F_PAD

    tb = _pick_row_block(b)
    grid = (pl.cdiv(b, tb),)

    batch_map = lambda i: (i, 0)
    full_map = lambda i: (0, 0)

    out_padded = pl.pallas_call(
        mid_triangle1_kernel,
        out_shape=jax.ShapeDtypeStruct((b, fp), jnp.float32),
        grid=grid,
        in_specs=[
            pl.BlockSpec((tb, f_in), batch_map),            # input_up (bf16)
            pl.BlockSpec((tb, 2 * OUT_FEATURES), batch_map),  # d0|d1 concat (bf16, 128 lanes)
            pl.BlockSpec((f_in, fp), full_map),             # W1^T padded (bf16)
            pl.BlockSpec((2 * OUT_FEATURES + fp, fp), full_map),  # W2^T padded (bf16)
            pl.BlockSpec((fp, fp), full_map),               # Wvo = Wv^T Wo^T padded (bf16)
            pl.BlockSpec((8, fp), full_map),                # packed row params + mask (f32)
        ],
        out_specs=pl.BlockSpec((tb, fp), batch_map),
        compiler_params=pltpu.CompilerParams(
            dimension_semantics=("parallel",)),             # v7x: both TCs when grid >= 2
    )(up_bf, dcat_bf, folded["w1p"], folded["w2p"], folded["wvop"], folded["rows"])

    return out_padded[:, :OUT_FEATURES]


mid_triangle1_apply = jax.jit(_mid_triangle1_apply)


# ------------------------- parameter construction -------------------------- #
def make_params(key):
    ks = jax.random.split(key, 8)
    s = 0.05
    f_in, f = IN_FEATURES, OUT_FEATURES

    # nn.Linear stores weight as (out, in); we also keep (in, out) transposes.
    w1 = jax.random.normal(ks[0], (f, f_in), jnp.float32) * s
    b1 = jax.random.normal(ks[1], (f,), jnp.float32) * s
    w2 = jax.random.normal(ks[2], (f, f * NUM_NODES), jnp.float32) * s
    b2 = jax.random.normal(ks[3], (f,), jnp.float32) * s
    # MHA in_proj_weight is (3E, E); the V slice is rows 2E:3E.
    in_proj_w = jax.random.normal(ks[4], (3 * f, f), jnp.float32) * s
    in_proj_b = jax.random.normal(ks[5], (3 * f,), jnp.float32) * s
    out_proj_w = jax.random.normal(ks[6], (f, f), jnp.float32) * s
    out_proj_b = jax.random.normal(ks[7], (f,), jnp.float32) * s

    return {
        "w1": w1, "b1": b1, "w2": w2, "b2": b2,
        "g1": jnp.ones((f,), jnp.float32), "be1": jnp.zeros((f,), jnp.float32),
        "g2": jnp.ones((f,), jnp.float32), "be2": jnp.zeros((f,), jnp.float32),
        "in_proj_w": in_proj_w, "in_proj_b": in_proj_b,
        "out_proj_w": out_proj_w, "out_proj_b": out_proj_b,
        # pre-transposed (in, out) layouts used by fold_params
        "w1_t": w1.T, "w2_t": w2.T,
        "wv_t": in_proj_w[2 * f:3 * f, :].T, "bv": in_proj_b[2 * f:3 * f],
        "wo_t": out_proj_w.T, "bo": out_proj_b,
    }


# ----------------------------- references ---------------------------------- #
def reference_matched(input_up, input_down, folded):
    """Pure-JAX version of the *exact* kernel math (same bf16 casts, padding, fused Wvo)."""
    up_bf = input_up.astype(jnp.bfloat16)
    dcat_bf = jnp.concatenate(input_down, axis=1).astype(jnp.bfloat16)
    out = _forward_math(up_bf, dcat_bf, folded["w1p"], folded["w2p"],
                        folded["wvop"], folded["rows"])
    return out[:, :OUT_FEATURES]


def reference_full_f32(input_up, input_down, p):
    """Full f32 / exact-GELU / full-MHA reference matching the PyTorch module."""
    f = OUT_FEATURES
    h = input_up @ p["w1"].T + p["b1"]
    h = _gelu_exact(_layernorm(h, p["g1"], p["be1"]))
    x_cat = jnp.concatenate(list(input_down) + [h], axis=1)
    xm = x_cat @ p["w2"].T + p["b2"]
    xm = _gelu_exact(_layernorm(xm, p["g2"], p["be2"]))

    x = xm[:, None, :]                                         # (B, 1, E)
    qkv = x @ p["in_proj_w"].T + p["in_proj_b"]                # (B, 1, 3E)
    q, k, v = qkv[..., :f], qkv[..., f:2 * f], qkv[..., 2 * f:]
    hd = f // NUM_HEADS
    bsz = x.shape[0]
    q = q.reshape(bsz, 1, NUM_HEADS, hd).transpose(0, 2, 1, 3)
    k = k.reshape(bsz, 1, NUM_HEADS, hd).transpose(0, 2, 1, 3)
    v = v.reshape(bsz, 1, NUM_HEADS, hd).transpose(0, 2, 1, 3)
    scores = jnp.einsum("bhqd,bhkd->bhqk", q, k) / jnp.sqrt(float(hd))
    w = jax.nn.softmax(scores, axis=-1)                        # == 1.0 (seq len 1)
    o = jnp.einsum("bhqk,bhkd->bhqd", w, v)
    o = o.transpose(0, 2, 1, 3).reshape(bsz, 1, f)
    attn = o @ p["out_proj_w"].T + p["out_proj_b"]
    return attn[:, 0, :] + h


# ---------------------------------- main ----------------------------------- #
if __name__ == "__main__":
    key = jax.random.PRNGKey(0)
    k_up, k_d0, k_d1, k_p = jax.random.split(key, 4)

    input_up = jax.random.normal(k_up, (BATCH, IN_FEATURES), jnp.float32)
    input_down = [
        jax.random.normal(k_d0, (BATCH, OUT_FEATURES), jnp.float32),
        jax.random.normal(k_d1, (BATCH, OUT_FEATURES), jnp.float32),
    ]
    params = make_params(k_p)

    # Weight folding / padding done ONCE at parameter-load time (hoisted per review).
    folded = fold_params(params)

    out = jax.block_until_ready(
        mid_triangle1_apply(input_up, input_down[0], input_down[1], folded))
    assert out.shape == (BATCH, OUT_FEATURES), out.shape

    # (1) Tight check: kernel reproduces its intended math (same bf16 operand casts,
    #     same lane padding, same masked LayerNorm, same fused Wvo) in pure JAX.
    ref_m = reference_matched(input_up, input_down, folded)
    err_m = float(jnp.max(jnp.abs(out - ref_m)))
    assert jnp.allclose(out, ref_m, atol=2e-3, rtol=2e-3), err_m

    # (2) Semantic check vs. the f32 / exact-GELU / full-MHA reference (PyTorch
    #     semantics). Tolerance = bf16 matmul-operand precision budget (+ tanh-GELU
    #     approximation), both intentional perf trade-offs.
    ref_f = reference_full_f32(input_up, list(input_down), params)
    err_f = float(jnp.max(jnp.abs(out - ref_f)))
    assert err_f < 5e-2, err_f

    print("KERNEL_OK")
</pallas_src>

<mosaic_0001>
module attributes {stable_mosaic.version = 11 : i64} {
  func.func @mid_triangle1_kernel(%arg0: i32, %arg1: memref<8x32xbf16, #tpu.memory_space<vmem>>, %arg2: memref<8x128xbf16, #tpu.memory_space<vmem>>, %arg3: memref<32x128xbf16, #tpu.memory_space<vmem>>, %arg4: memref<256x128xbf16, #tpu.memory_space<vmem>>, %arg5: memref<128x128xbf16, #tpu.memory_space<vmem>>, %arg6: memref<8x128xf32, #tpu.memory_space<vmem>>, %arg7: memref<8x128xf32, #tpu.memory_space<vmem>>) attributes {dimension_semantics = [#tpu.dimension_semantics<parallel>], iteration_bounds = array<i64: 1>, scalar_prefetch = 0 : i64, scratch_operands = 0 : i64, tpu.core_type = #tpu.core_type<tc>, window_params = [{transform_indices = @transform_0, window_bounds = array<i64: 8, 32>}, {transform_indices = @transform_1, window_bounds = array<i64: 8, 128>}, {pipeline_mode = #tpu.pipeline_mode<synchronous>, transform_indices = @transform_2, window_bounds = array<i64: 32, 128>}, {pipeline_mode = #tpu.pipeline_mode<synchronous>, transform_indices = @transform_3, window_bounds = array<i64: 256, 128>}, {pipeline_mode = #tpu.pipeline_mode<synchronous>, transform_indices = @transform_4, window_bounds = array<i64: 128, 128>}, {pipeline_mode = #tpu.pipeline_mode<synchronous>, transform_indices = @transform_5, window_bounds = array<i64: 8, 128>}, {transform_indices = @transform_6, window_bounds = array<i64: 8, 128>}]} {
    %c0 = arith.constant 0 : index
    %c0_0 = arith.constant 0 : index
    %0 = vector.load %arg1[%c0, %c0_0] : memref<8x32xbf16, #tpu.memory_space<vmem>>, vector<8x32xbf16>
    %c0_1 = arith.constant 0 : index
    %c0_2 = arith.constant 0 : index
    %1 = vector.load %arg2[%c0_1, %c0_2] : memref<8x128xbf16, #tpu.memory_space<vmem>>, vector<8x128xbf16>
    %c0_3 = arith.constant 0 : index
    %c0_4 = arith.constant 0 : index
    %2 = vector.load %arg3[%c0_3, %c0_4] : memref<32x128xbf16, #tpu.memory_space<vmem>>, vector<32x128xbf16>
    %c0_5 = arith.constant 0 : index
    %c0_6 = arith.constant 0 : index
    %3 = vector.load %arg4[%c0_5, %c0_6] : memref<256x128xbf16, #tpu.memory_space<vmem>>, vector<256x128xbf16>
    %c0_7 = arith.constant 0 : index
    %c0_8 = arith.constant 0 : index
    %4 = vector.load %arg5[%c0_7, %c0_8] : memref<128x128xbf16, #tpu.memory_space<vmem>>, vector<128x128xbf16>
    %c0_9 = arith.constant 0 : index
    %c0_10 = arith.constant 0 : index
    %5 = vector.load %arg6[%c0_9, %c0_10] : memref<8x128xf32, #tpu.memory_space<vmem>>, vector<8x128xf32>
    %6 = vector.extract_strided_slice %5 {offsets = [0, 0], sizes = [1, 128], strides = [1, 1]} : vector<8x128xf32> to vector<1x128xf32>
    %7 = vector.extract_strided_slice %5 {offsets = [1, 0], sizes = [1, 128], strides = [1, 1]} : vector<8x128xf32> to vector<1x128xf32>
    %8 = vector.extract_strided_slice %5 {offsets = [2, 0], sizes = [1, 128], strides = [1, 1]} : vector<8x128xf32> to vector<1x128xf32>
    %9 = vector.extract_strided_slice %5 {offsets = [3, 0], sizes = [1, 128], strides = [1, 1]} : vector<8x128xf32> to vector<1x128xf32>
    %10 = vector.extract_strided_slice %5 {offsets = [4, 0], sizes = [1, 128], strides = [1, 1]} : vector<8x128xf32> to vector<1x128xf32>
    %11 = vector.extract_strided_slice %5 {offsets = [5, 0], sizes = [1, 128], strides = [1, 1]} : vector<8x128xf32> to vector<1x128xf32>
    %12 = vector.extract_strided_slice %5 {offsets = [6, 0], sizes = [1, 128], strides = [1, 1]} : vector<8x128xf32> to vector<1x128xf32>
    %13 = vector.extract_strided_slice %5 {offsets = [7, 0], sizes = [1, 128], strides = [1, 1]} : vector<8x128xf32> to vector<1x128xf32>
    %cst = arith.constant dense<0.000000e+00> : vector<8x128xf32>
    %14 = tpu.matmul %0, %2, %cst {dimension_numbers = #tpu.dot_dimension_numbers<[1], [0], [0], [1], [0, 0, 1, 1], [], []>} : vector<8x32xbf16>, vector<32x128xbf16>, vector<8x128xf32> -> vector<8x128xf32>
    %15 = vector.broadcast %6 : vector<1x128xf32> to vector<8x128xf32>
    %16 = arith.addf %14, %15 : vector<8x128xf32>
    %cst_11 = arith.constant dense<0.000000e+00> : vector<8xf32>
    %17 = vector.multi_reduction <add>, %16, %cst_11 [1] : vector<8x128xf32> to vector<8xf32>
    %18 = vector.shape_cast %17 : vector<8xf32> to vector<8x1xf32>
    %cst_12 = arith.constant 1.562500e-02 : f32
    %19 = vector.broadcast %cst_12 : f32 to vector<8x1xf32>
    %20 = arith.mulf %18, %19 : vector<8x1xf32>
    %21 = vector.broadcast %20 : vector<8x1xf32> to vector<8x128xf32>
    %22 = arith.subf %16, %21 : vector<8x128xf32>
    %23 = vector.broadcast %13 : vector<1x128xf32> to vector<8x128xf32>
    %24 = arith.mulf %22, %23 : vector<8x128xf32>
    %25 = arith.mulf %24, %24 : vector<8x128xf32>
    %cst_13 = arith.constant dense<0.000000e+00> : vector<8xf32>
    %26 = vector.multi_reduction <add>, %25, %cst_13 [1] : vector<8x128xf32> to vector<8xf32>
    %27 = vector.shape_cast %26 : vector<8xf32> to vector<8x1xf32>
    %cst_14 = arith.constant 1.562500e-02 : f32
    %28 = vector.broadcast %cst_14 : f32 to vector<8x1xf32>
    %29 = arith.mulf %27, %28 : vector<8x1xf32>
    %cst_15 = arith.constant 9.99999974E-6 : f32
    %30 = vector.broadcast %cst_15 : f32 to vector<8x1xf32>
    %31 = arith.addf %29, %30 : vector<8x1xf32>
    %32 = math.rsqrt %31 : vector<8x1xf32>
    %33 = vector.broadcast %32 : vector<8x1xf32> to vector<8x128xf32>
    %34 = arith.mulf %24, %33 : vector<8x128xf32>
    %35 = vector.broadcast %7 : vector<1x128xf32> to vector<8x128xf32>
    %36 = arith.mulf %34, %35 : vector<8x128xf32>
    %37 = vector.broadcast %8 : vector<1x128xf32> to vector<8x128xf32>
    %38 = arith.addf %36, %37 : vector<8x128xf32>
    %cst_16 = arith.constant 5.000000e-01 : f32
    %39 = vector.broadcast %cst_16 : f32 to vector<8x128xf32>
    %40 = arith.mulf %39, %38 : vector<8x128xf32>
    %cst_17 = arith.constant 4.471500e-02 : f32
    %41 = vector.broadcast %cst_17 : f32 to vector<8x128xf32>
    %42 = arith.mulf %41, %38 : vector<8x128xf32>
    %43 = arith.mulf %42, %38 : vector<8x128xf32>
    %44 = arith.mulf %43, %38 : vector<8x128xf32>
    %45 = arith.addf %38, %44 : vector<8x128xf32>
    %cst_18 = arith.constant 0.797884583 : f32
    %46 = vector.broadcast %cst_18 : f32 to vector<8x128xf32>
    %47 = arith.mulf %46, %45 : vector<8x128xf32>
    %48 = math.tanh %47 : vector<8x128xf32>
    %cst_19 = arith.constant 1.000000e+00 : f32
    %49 = vector.broadcast %cst_19 : f32 to vector<8x128xf32>
    %50 = arith.addf %49, %48 : vector<8x128xf32>
    %51 = arith.mulf %40, %50 : vector<8x128xf32>
    %52 = vector.extract_strided_slice %3 {offsets = [0, 0], sizes = [128, 128], strides = [1, 1]} : vector<256x128xbf16> to vector<128x128xbf16>
    %cst_20 = arith.constant dense<0.000000e+00> : vector<8x128xf32>
    %53 = tpu.matmul %1, %52, %cst_20 {dimension_numbers = #tpu.dot_dimension_numbers<[1], [0], [0], [1], [0, 0, 1, 1], [], []>} : vector<8x128xbf16>, vector<128x128xbf16>, vector<8x128xf32> -> vector<8x128xf32>
    %54 = arith.truncf %51 : vector<8x128xf32> to vector<8x128xbf16>
    %55 = vector.extract_strided_slice %3 {offsets = [128, 0], sizes = [128, 128], strides = [1, 1]} : vector<256x128xbf16> to vector<128x128xbf16>
    %cst_21 = arith.constant dense<0.000000e+00> : vector<8x128xf32>
    %56 = tpu.matmul %54, %55, %cst_21 {dimension_numbers = #tpu.dot_dimension_numbers<[1], [0], [0], [1], [0, 0, 1, 1], [], []>} : vector<8x128xbf16>, vector<128x128xbf16>, vector<8x128xf32> -> vector<8x128xf32>
    %57 = arith.addf %53, %56 : vector<8x128xf32>
    %58 = vector.broadcast %9 : vector<1x128xf32> to vector<8x128xf32>
    %59 = arith.addf %57, %58 : vector<8x128xf32>
    %cst_22 = arith.constant dense<0.000000e+00> : vector<8xf32>
    %60 = vector.multi_reduction <add>, %59, %cst_22 [1] : vector<8x128xf32> to vector<8xf32>
    %61 = vector.shape_cast %60 : vector<8xf32> to vector<8x1xf32>
    %cst_23 = arith.constant 1.562500e-02 : f32
    %62 = vector.broadcast %cst_23 : f32 to vector<8x1xf32>
    %63 = arith.mulf %61, %62 : vector<8x1xf32>
    %64 = vector.broadcast %63 : vector<8x1xf32> to vector<8x128xf32>
    %65 = arith.subf %59, %64 : vector<8x128xf32>
    %66 = vector.broadcast %13 : vector<1x128xf32> to vector<8x128xf32>
    %67 = arith.mulf %65, %66 : vector<8x128xf32>
    %68 = arith.mulf %67, %67 : vector<8x128xf32>
    %cst_24 = arith.constant dense<0.000000e+00> : vector<8xf32>
    %69 = vector.multi_reduction <add>, %68, %cst_24 [1] : vector<8x128xf32> to vector<8xf32>
    %70 = vector.shape_cast %69 : vector<8xf32> to vector<8x1xf32>
    %cst_25 = arith.constant 1.562500e-02 : f32
    %71 = vector.broadcast %cst_25 : f32 to vector<8x1xf32>
    %72 = arith.mulf %70, %71 : vector<8x1xf32>
    %cst_26 = arith.constant 9.99999974E-6 : f32
    %73 = vector.broadcast %cst_26 : f32 to vector<8x1xf32>
    %74 = arith.addf %72, %73 : vector<8x1xf32>
    %75 = math.rsqrt %74 : vector<8x1xf32>
    %76 = vector.broadcast %75 : vector<8x1xf32> to vector<8x128xf32>
    %77 = arith.mulf %67, %76 : vector<8x128xf32>
    %78 = vector.broadcast %10 : vector<1x128xf32> to vector<8x128xf32>
    %79 = arith.mulf %77, %78 : vector<8x128xf32>
    %80 = vector.broadcast %11 : vector<1x128xf32> to vector<8x128xf32>
    %81 = arith.addf %79, %80 : vector<8x128xf32>
    %cst_27 = arith.constant 5.000000e-01 : f32
    %82 = vector.broadcast %cst_27 : f32 to vector<8x128xf32>
    %83 = arith.mulf %82, %81 : vector<8x128xf32>
    %cst_28 = arith.constant 4.471500e-02 : f32
    %84 = vector.broadcast %cst_28 : f32 to vector<8x128xf32>
    %85 = arith.mulf %84, %81 : vector<8x128xf32>
    %86 = arith.mulf %85, %81 : vector<8x128xf32>
    %87 = arith.mulf %86, %81 : vector<8x128xf32>
    %88 = arith.addf %81, %87 : vector<8x128xf32>
    %cst_29 = arith.constant 0.797884583 : f32
    %89 = vector.broadcast %cst_29 : f32 to vector<8x128xf32>
    %90 = arith.mulf %89, %88 : vector<8x128xf32>
    %91 = math.tanh %90 : vector<8x128xf32>
    %cst_30 = arith.constant 1.000000e+00 : f32
    %92 = vector.broadcast %cst_30 : f32 to vector<8x128xf32>
    %93 = arith.addf %92, %91 : vector<8x128xf32>
    %94 = arith.mulf %83, %93 : vector<8x128xf32>
    %95 = arith.truncf %94 : vector<8x128xf32> to vector<8x128xbf16>
    %cst_31 = arith.constant dense<0.000000e+00> : vector<8x128xf32>
    %96 = tpu.matmul %95, %4, %cst_31 {dimension_numbers = #tpu.dot_dimension_numbers<[1], [0], [0], [1], [0, 0, 1, 1], [], []>} : vector<8x128xbf16>, vector<128x128xbf16>, vector<8x128xf32> -> vector<8x128xf32>
    %97 = vector.broadcast %12 : vector<1x128xf32> to vector<8x128xf32>
    %98 = arith.addf %96, %97 : vector<8x128xf32>
    %99 = arith.addf %98, %51 : vector<8x128xf32>
    %c0_32 = arith.constant 0 : index
    %c0_33 = arith.constant 0 : index
    %100 = vector.load %arg7[%c0_32, %c0_33] : memref<8x128xf32, #tpu.memory_space<vmem>>, vector<8x128xf32>
    tpu.vector_store %arg7[%c0_32, %c0_33], %99 {strides = array<i32>} : memref<8x128xf32, #tpu.memory_space<vmem>>, vector<8x128xf32>,
    return
  }
  func.func @transform_0(%arg0: i32) -> (i32, i32) {
    %c0_i32 = arith.constant 0 : i32
    %c0_i32_0 = arith.constant 0 : i32
    return %arg0, %c0_i32 : i32, i32
  }
  func.func @transform_1(%arg0: i32) -> (i32, i32) {
    %c0_i32 = arith.constant 0 : i32
    %c0_i32_0 = arith.constant 0 : i32
    return %arg0, %c0_i32 : i32, i32
  }
  func.func @transform_2(%arg0: i32) -> (i32, i32) {
    %c0_i32 = arith.constant 0 : i32
    %c0_i32_0 = arith.constant 0 : i32
    %c0_i32_1 = arith.constant 0 : i32
    return %c0_i32, %c0_i32_0 : i32, i32
  }
  func.func @transform_3(%arg0: i32) -> (i32, i32) {
    %c0_i32 = arith.constant 0 : i32
    %c0_i32_0 = arith.constant 0 : i32
    %c0_i32_1 = arith.constant 0 : i32
    return %c0_i32, %c0_i32_0 : i32, i32
  }
  func.func @transform_4(%arg0: i32) -> (i32, i32) {
    %c0_i32 = arith.constant 0 : i32
    %c0_i32_0 = arith.constant 0 : i32
    %c0_i32_1 = arith.constant 0 : i32
    return %c0_i32, %c0_i32_0 : i32, i32
  }
  func.func @transform_5(%arg0: i32) -> (i32, i32) {
    %c0_i32 = arith.constant 0 : i32
    %c0_i32_0 = arith.constant 0 : i32
    %c0_i32_1 = arith.constant 0 : i32
    return %c0_i32, %c0_i32_0 : i32, i32
  }
  func.func @transform_6(%arg0: i32) -> (i32, i32) {
    %c0_i32 = arith.constant 0 : i32
    %c0_i32_0 = arith.constant 0 : i32
    return %arg0, %c0_i32 : i32, i32
  }
}

</mosaic_0001>

<bundles_post_ra>
// kernel: _mid_triangle1_apply.1
= control target key start
LH: loop header
LB: loop body
LE: loop exit
PB: predicated region body
PF: predicated region fallthrough
CT: control target
= control target key end

     0   :  { %11 = vsyncpa [#allocation3], 0  ;;  %s724_s0 = inlined_call_operand.vmem [shape: bf16[8,32], index: 0, kind: input, shape index: {}]   ;;  %s725_s1 = inlined_call_operand.vmem [shape: bf16[8,128], index: 1, kind: input, shape index: {}]   ;;  %s726_s2 = inlined_call_operand.vmem [shape: bf16[32,128], index: 2, kind: input, shape index: {}]   ;;  %s727_s3 = inlined_call_operand.hbm [shape: bf16[256,128], index: 3, kind: input, shape index: {}]   ;;  %s728_s4 = inlined_call_operand.hbm [shape: bf16[128,128], index: 4, kind: input, shape index: {}]   ;;  %s729_s5 = inlined_call_operand.vmem [shape: f32[8,128], index: 5, kind: input, shape index: {}]   ;;  %s730_s6 = inlined_call_operand.hbm [shape: f32[8,128], index: 6, kind: output, shape index: {}]  }
   0x1   :  { %12 = vsyncpa [#allocation6], 0 }
   0x2   :  { %13 = vsyncpa [#allocation4], 0  ;;  %s24_s23 = sshll.u32 %s727_s3, 4  ;;  %s641_s24 = smov [#allocation2]   ;;  %s25_s23 = int_to_ptr.hbm [resolvable:$true] %s24_s23 }
   0x3   :  { %s26_s25 = sshll.u32 %s641_s24, 4  ;;  %s37_s28 = sshll.u32 %s728_s4, 4  ;;  %s27_s25 = int_to_ptr.vmem [resolvable:$true] %s26_s25  ;;  %s38_s28 = int_to_ptr.hbm [resolvable:$true] %s37_s28 }
   0x4   :  { %s642_s29 = smov 64   ;;  %s643_s30 = smov 4  }
   0x5   :  { %32 = dma.hbm_to_vmem [thread:$0]  %s25_s23, 2048, %s27_s25, [#allocation3], %s642_s29, %s642_s29, %s643_s30  }
   0x6   :  { %s644_s7 = smov [#allocation5]  }
   0x7   :  { %s39_s8 = sshll.u32 %s644_s7, 4  ;;  %s40_s8 = int_to_ptr.vmem [resolvable:$true] %s39_s8 }
   0x8   :  { %45 = dma.hbm_to_vmem [thread:$0]  %s38_s28, 1024, %s40_s8, [#allocation6], %s642_s29, %s642_s29, %s643_s30  }
   0x9   :  { %635 = dma.done.wait [#allocation3], 2048  }
   0xa   :  { %636 = vsyncadd [#allocation3], 4294965248 }
   0xb   :  { %637 = dma.done.wait [#allocation6], 1024  }
   0xc   :  { %638 = vsyncadd [#allocation6], 4294966272  ;;  %v525_v0 = vld [vmem:[%s726_s2 + $0x8] sm:$0xff]  ;;  %v524_v1 = vld [vmem:[%s726_s2] sm:$0xff]  ;;  %vm125_vm0 = vcmask 261120   ;;  %s408_s17 = sshll.u32 %s730_s6, 4  ;;  %s409_s17 = int_to_ptr.hbm [resolvable:$true] %s408_s17 }
   0xd   :  { %135 = vmatpush.bf16.msra.mxu0 %v525_v0  ;;  %v57_v2 = vld [vmem:[%s724_s0] sm:$0xf]  ;;  %v533_v14 = vld [vmem:[#allocation2 + $0x38] sm:$0xff]  ;;  %v532_v15 = vld [vmem:[#allocation2 + $0x30] sm:$0xff] }
   0xe   :  { %v699_v3 = vld [vmem:[%s729_s5] sm:$0xff]  ;;  %287 = vmatpush.bf16.msra.mxu2 %v533_v14  ;;  %v531_v16 = vld [vmem:[#allocation2 + $0x28] sm:$0xff]  ;;  %v541_v18 = vld [vmem:[#allocation2 + $0x78] sm:$0xff] }
   0xf   :  { %v112_v4 = vperm.slane %v699_v3, 0  ;;  %v146_v10 = vperm.slane %v699_v3, 7  ;;  %v530_v17 = vld [vmem:[#allocation2 + $0x20] sm:$0xff]  ;;  %226 = vmatpush.bf16.msra.mxu1 %v541_v18  ;;  %v529_v19 = vld [vmem:[#allocation2 + $0x18] sm:$0xff]  ;;  %v540_v20 = vld [vmem:[#allocation2 + $0x70] sm:$0xff]  ;;  %v164_v40 = vperm.slane %v699_v3, 1 }
  0x10   :  { %v528_v21 = vld [vmem:[#allocation2 + $0x10] sm:$0xff]  ;;  %v539_v22 = vld [vmem:[#allocation2 + $0x68] sm:$0xff]  ;;  %v538_v24 = vld [vmem:[#allocation2 + $0x60] sm:$0xff]  ;;  %v166_v42 = vperm.slane %v699_v3, 2  ;;  %v300_v58 = vperm.slane %v699_v3, 3 }
  0x11   :  { %136 = vmatpush.bf16.msra.mxu0 %v524_v1  ;;  %v527_v23 = vld [vmem:[#allocation2 + $0x8] sm:$0xff]  ;;  %v526_v25 = vld [vmem:[#allocation2] sm:$0xff]  ;;  %v537_v28 = vld [vmem:[#allocation2 + $0x58] sm:$0xff] }
  0x12   :  { %288 = vmatpush.bf16.msra.mxu2 %v532_v15  ;;  %v58_v30 = vld [vmem:[%s725_s1] sm:$0xf]  ;;  %v536_v31 = vld [vmem:[#allocation2 + $0x50] sm:$0xff]  ;;  %v535_v32 = vld [vmem:[#allocation2 + $0x48] sm:$0xff]  ;;  %s645_s1 = smov [#allocation7]  }
  0x13   :  { %227 = vmatpush.bf16.msra.mxu1 %v540_v20  ;;  %v534_v35 = vld [vmem:[#allocation2 + $0x40] sm:$0xff]  ;;  %v544_v14 = vld [vmem:[#allocation5 + $0x10] sm:$0xff]  ;;  %v543_v15 = vld [vmem:[#allocation5 + $0x8] sm:$0xff]  ;;  %s406_s5 = sshll.u32 %s645_s1, 4  ;;  %s407_s5 = int_to_ptr.vmem [resolvable:$true] %s406_s5 }
  0x14   :  { %427 = vmatmul.msk.bf16.vlgmr.msra.gmra.mxu0 %vm125_vm0, %v57_v2 }
  0x16   :  { %289 = vmatpush.bf16.msra.mxu2 %v531_v16 }
  0x17   :  { %228 = vmatpush.bf16.msra.mxu1 %v539_v22  ;;  %v323_v22 = vperm.slane %v699_v3, 4 }
  0x1a   :  { %290 = vmatpush.bf16.msra.mxu2 %v530_v17  ;;  %v542_v17 = vld [vmem:[#allocation5] sm:$0xff] }
  0x1b   :  { %229 = vmatpush.bf16.msra.mxu1 %v538_v24  ;;  %v325_v24 = vperm.slane %v699_v3, 5 }
  0x1e   :  { %291 = vmatpush.bf16.msra.mxu2 %v529_v19 }
  0x1f   :  { %230 = vmatpush.bf16.msra.mxu1 %v537_v28 }
  0x22   :  { %292 = vmatpush.bf16.msra.mxu2 %v528_v21 }
  0x23   :  { %231 = vmatpush.bf16.msra.mxu1 %v536_v31 }
  0x26   :  { %293 = vmatpush.bf16.msra.mxu2 %v527_v23 }
  0x27   :  { %232 = vmatpush.bf16.msra.mxu1 %v535_v32 }
  0x2a   :  { %294 = vmatpush.bf16.msra.mxu2 %v526_v25 }
  0x2b   :  { %233 = vmatpush.bf16.msra.mxu1 %v534_v35 }
  0x2d   :  { %295 = vmatmul.bf16.vlgmr.msra.gmra.mxu2 %v58_v30 }
  0x91   :  { %v138_v5 = vpop.f32.mrf.mxu0 }
  0x92   :  { %v139_v6 = vadd.f32 %v138_v5, %v112_v4  ;;  %v549_v5 = vld [vmem:[#allocation5 + $0x38] sm:$0xff] }
  0x93   :  { %386 = vmatpush.bf16.msra.mxu3 %v549_v5 }
  0x94   :  { %142 = vadd.xlane.f32.xlu0 %v139_v6 }
  0x99   :  { %v140_v7 = vpop.f32.mrf.mxu0 }
  0x9a   :  { %v547_v7 = vld [vmem:[#allocation5 + $0x28] sm:$0xff] }
  0xb0   :  { %v296_v56 = vpop.f32.mrf.mxu2 }
  0xb8   :  { %v298_v57 = vpop.f32.mrf.mxu2 }
 0x107   :  { %v143_v8 = vpop.xlane.xlu0 %142 }
 0x108   :  { %v144_v9 = vmul.f32 0.015625, %v143_v8  ;;  %v546_v8 = vld [vmem:[#allocation5 + $0x20] sm:$0xff] }
 0x10a   :  { %v145_v11 = vsub.f32 %v139_v6, %v144_v9  ;;  %v548_v6 = vld [vmem:[#allocation5 + $0x30] sm:$0xff] }
 0x10b   :  { %387 = vmatpush.bf16.msra.mxu3 %v548_v6 }
 0x10c   :  { %v147_v12 = vmul.f32 %v146_v10, %v145_v11 }
 0x10e   :  { %v148_v13 = vmul.f32 %v147_v12, %v147_v12 }
 0x10f   :  { %388 = vmatpush.bf16.msra.mxu3 %v547_v7 }
 0x110   :  { %149 = vadd.xlane.f32.xlu0 %v148_v13 }
 0x113   :  { %389 = vmatpush.bf16.msra.mxu3 %v546_v8 }
 0x183   :  { %v150_v26 = vpop.xlane.xlu0 %149 }
 0x184   :  { %v151_v27 = vmul.f32 0.015625, %v150_v26 }
 0x186   :  { %v152_v29 = vadd.f32 1e-05, %v151_v27 }
 0x188   :  { %555 = vrsqrt.f32 %v152_v29  ;;  %vm159_vm2 = vweird.f32 %v152_v29 }
 0x18e   :  { %v556_v33 = vpop.eup %555 }
 0x18f   :  { %v154_v34 = vmul.f32 %v556_v33, %v152_v29  ;;  %vm160_vm1 = vweird.f32 %v556_v33 }
 0x190   :  { %vm161_vm3 = vmor %vm159_vm2, %vm160_vm1 }
 0x191   :  { %v155_v36 = vmul.f32 %v556_v33, %v154_v34 }
 0x193   :  { %v156_v37 = vmul.f32 0.5, %v155_v36 }
 0x195   :  { %v157_v38 = vsub.f32 1.5, %v156_v37 }
 0x197   :  { %v158_v39 = vmul.f32 %v556_v33, %v157_v38  ;;  %v337_v38 = vperm.slane %v699_v3, 6 }
 0x199   :  { %v162_v41 = vsel %vm161_vm3, %v556_v33, %v158_v39 }
 0x19a   :  { %v163_v43 = vmul.f32 %v162_v41, %v147_v12  ;;  %v545_v12 = vld [vmem:[#allocation5 + $0x18] sm:$0xff] }
 0x19b   :  { %390 = vmatpush.bf16.msra.mxu3 %v545_v12 }
 0x19c   :  { %v165_v44 = vmul.f32 %v164_v40, %v163_v43 }
 0x19e   :  { %v167_v45 = vadd.f32 %v166_v42, %v165_v44 }
 0x19f   :  { %391 = vmatpush.bf16.msra.mxu3 %v544_v14 }
 0x1a0   :  { %v169_v46 = vmul.f32 0.044715, %v167_v45  ;;  %v168_v52 = vmul.f32 0.5, %v167_v45 }
 0x1a2   :  { %v170_v47 = vmul.f32 %v169_v46, %v167_v45 }
 0x1a3   :  { %392 = vmatpush.bf16.msra.mxu3 %v543_v15 }
 0x1a4   :  { %v171_v48 = vmul.f32 %v170_v47, %v167_v45 }
 0x1a6   :  { %v172_v49 = vadd.f32 %v171_v48, %v167_v45 }
 0x1a7   :  { %393 = vmatpush.bf16.msra.mxu3 %v542_v17 }
 0x1a8   :  { %v173_v50 = vmul.f32 0.7978846, %v172_v49 }
 0x1aa   :  { %557 = vtanh.f32 %v173_v50 }
 0x1b0   :  { %v558_v51 = vpop.eup %557 }
 0x1b1   :  { %v175_v53 = vadd.f32 1.0, %v558_v51 }
 0x1b3   :  { %v710_v54 = vmul.f32 %v175_v53, %v168_v52 }
 0x1b5   :  { %v177_v55 = vpack.c.bf16 %v710_v54, %v710_v54 }
 0x1b7   :  { %234 = vmatmul.bf16.vlgmr.msra.gmra.mxu1 %v177_v55 }
 0x234   :  { %v235_v59 = vpop.f32.mrf.mxu1 }
 0x235   :  { %v297_v60 = vadd.f32 %v296_v56, %v235_v59 }
 0x237   :  { %v301_v61 = vadd.f32 %v300_v58, %v297_v60 }
 0x239   :  { %302 = vadd.xlane.f32.xlu1 %v301_v61 }
 0x23c   :  { %v237_v62 = vpop.f32.mrf.mxu1 }
 0x2ac   :  { %v303_v63 = vpop.xlane.xlu1 %302 }
 0x2ad   :  { %v304_v0 = vmul.f32 0.015625, %v303_v63 }
 0x2af   :  { %v305_v1 = vsub.f32 %v301_v61, %v304_v0 }
 0x2b1   :  { %v306_v2 = vmul.f32 %v305_v1, %v146_v10 }
 0x2b3   :  { %v307_v4 = vmul.f32 %v306_v2, %v306_v2 }
 0x2b5   :  { %308 = vadd.xlane.f32.xlu1 %v307_v4 }
 0x328   :  { %v309_v9 = vpop.xlane.xlu1 %308 }
 0x329   :  { %v310_v11 = vmul.f32 0.015625, %v309_v9 }
 0x32b   :  { %v311_v13 = vadd.f32 1e-05, %v310_v11 }
 0x32d   :  { %559 = vrsqrt.f32 %v311_v13  ;;  %vm318_vm5 = vweird.f32 %v311_v13 }
 0x333   :  { %v560_v10 = vpop.eup %559 }
 0x334   :  { %v313_v16 = vmul.f32 %v560_v10, %v311_v13  ;;  %vm319_vm4 = vweird.f32 %v560_v10 }
 0x335   :  { %vm320_vm6 = vmor %vm318_vm5, %vm319_vm4 }
 0x336   :  { %v314_v18 = vmul.f32 %v560_v10, %v313_v16 }
 0x338   :  { %v315_v19 = vmul.f32 0.5, %v314_v18 }
 0x33a   :  { %v316_v20 = vsub.f32 1.5, %v315_v19 }
 0x33c   :  { %v317_v21 = vmul.f32 %v560_v10, %v316_v20 }
 0x33e   :  { %v321_v23 = vsel %vm320_vm6, %v560_v10, %v317_v21 }
 0x33f   :  { %v322_v25 = vmul.f32 %v321_v23, %v306_v2 }
 0x341   :  { %v324_v26 = vmul.f32 %v323_v22, %v322_v25 }
 0x343   :  { %v326_v27 = vadd.f32 %v325_v24, %v324_v26 }
 0x345   :  { %v328_v28 = vmul.f32 0.044715, %v326_v27  ;;  %v327_v34 = vmul.f32 0.5, %v326_v27 }
 0x347   :  { %v329_v29 = vmul.f32 %v328_v28, %v326_v27 }
 0x349   :  { %v330_v30 = vmul.f32 %v329_v29, %v326_v27 }
 0x34b   :  { %v331_v31 = vadd.f32 %v330_v30, %v326_v27 }
 0x34d   :  { %v332_v32 = vmul.f32 0.7978846, %v331_v31 }
 0x34f   :  { %561 = vtanh.f32 %v332_v32 }
 0x355   :  { %v562_v33 = vpop.eup %561 }
 0x356   :  { %v334_v35 = vadd.f32 1.0, %v562_v33 }
 0x358   :  { %v335_v36 = vmul.f32 %v334_v35, %v327_v34 }
 0x35a   :  { %v336_v37 = vpack.c.bf16 %v335_v36, %v335_v36 }
 0x35c   :  { %394 = vmatmul.bf16.vlgmr.msra.gmra.mxu3 %v336_v37 }
 0x3df   :  { %v395_v39 = vpop.f32.mrf.mxu3 }
 0x3e0   :  { %v396_v40 = vadd.f32 %v395_v39, %v337_v38 }
 0x3e2   :  { %v399_v41 = vadd.f32 %v396_v40, %v710_v54 }
 0x3e4   :  { %400 = vst [vmem:[#allocation7] sm:$0xff] %v399_v41 }
 0x3e5   :  { %411 = dma.vmem_to_hbm [thread:$0]  %s407_s5, 128, %s409_s17, [#allocation4]  }
 0x3e7   :  { %v397_v42 = vpop.f32.mrf.mxu3 }
 0x3e8   :  { %639 = dma.done.wait [#allocation4], 128  }
 0x3e9   :  { %640 = vsyncadd [#allocation4], 4294967168 }
 0x3ea   :  { %416 = vsyncpa [#allocation3], 1 }
 0x3eb   :  { %417 = vsyncpa [#allocation6], 1 }
 0x3ec   :  { %418 = vsyncpa [#allocation4], 1 }

</bundles_post_ra>
